<compile_context>
chip_gen: v7x
topology: tpu7x:2x2x1
jax: 0.10.0
libtpu: 0.0.40
codegen_flags: <defaults>
</compile_context>

<pallas_src>
import math
import functools

import numpy as np
import jax
import jax.numpy as jnp
from jax.experimental import pallas as pl
from jax.experimental.pallas import tpu as pltpu


def _encoder_kernel(src_ref, emb_ref, alpha_ref, bias_ref, out_ref,
                    *, vocab, d_model, eps):
    # src_ref:   (R, 1)      int32 token ids for this row tile
    # emb_ref:   (vocab, D)  full embedding table, resident in VMEM
    # alpha_ref: (1, D), bias_ref: (1, D)
    # out_ref:   (R, D)
    idx = src_ref[...]                                            # (R, 1) int32

    # --- fused embedding gather: one-hot(idx) @ table on the MXU (exact) ---
    rows = idx.shape[0]
    col = jax.lax.broadcasted_iota(jnp.int32, (rows, vocab), 1)   # lane iota
    onehot = (col == idx).astype(jnp.float32)                     # (R, vocab)
    x = jnp.dot(onehot, emb_ref[...].astype(jnp.float32),
                preferred_element_type=jnp.float32)               # (R, D)

    # --- NormLayer (encoder layers are identity stubs) ---
    mean = jnp.mean(x, axis=-1, keepdims=True)                    # (R, 1)
    centered = x - mean
    # PyTorch x.std() is unbiased (ddof = 1)
    var = jnp.sum(centered * centered, axis=-1, keepdims=True) / jnp.float32(d_model - 1)
    inv = pl.reciprocal(jnp.sqrt(var) + jnp.float32(eps))         # exact reciprocal
    out_ref[...] = (alpha_ref[...] * centered * inv + bias_ref[...]).astype(out_ref.dtype)


def encoder_forward(src, mask, emb_table, pe_table, alpha, bias,
                    *, eps=1e-6, max_row_tile=512):
    """src: int32 [B, S]; emb_table: [vocab, D]; pe_table: [1, max_seq, D];
    alpha/bias: [D].  Returns norm(embed(src)) exactly as the PyTorch forward."""
    del mask       # consumed only by the stub EncoderLayers
    del pe_table   # `s = pe(x)` is dead in the reference forward -> eliminated

    B, S = src.shape
    vocab, D = emb_table.shape
    rows = B * S

    # Row tiling: process [row_tile, D] rows per grid step (norm is per-row).
    rows_8 = -(-rows // 8) * 8                     # round up to sublane multiple
    row_tile = min(max_row_tile, rows_8)
    num_tiles = -(-rows // row_tile)
    padded = num_tiles * row_tile

    src_flat = src.reshape(rows).astype(jnp.int32)
    if padded != rows:
        src_flat = jnp.pad(src_flat, (0, padded - rows))   # pad gathers row 0 (sliced off)
    src2d = src_flat.reshape(padded, 1)

    alpha2 = alpha.reshape(1, D).astype(jnp.float32)
    bias2 = bias.reshape(1, D).astype(jnp.float32)

    kernel = functools.partial(_encoder_kernel, vocab=vocab, d_model=D, eps=eps)

    out = pl.pallas_call(
        kernel,
        out_shape=jax.ShapeDtypeStruct((padded, D), jnp.float32),
        grid_spec=pltpu.PrefetchScalarGridSpec(
            num_scalar_prefetch=0,
            grid=(num_tiles,),
            in_specs=[
                pl.BlockSpec((row_tile, 1), lambda r: (r, 0)),   # token ids
                pl.BlockSpec((vocab, D),    lambda r: (0, 0)),   # embedding table (revisited, not re-DMA'd)
                pl.BlockSpec((1, D),        lambda r: (0, 0)),   # alpha
                pl.BlockSpec((1, D),        lambda r: (0, 0)),   # bias
            ],
            out_specs=pl.BlockSpec((row_tile, D), lambda r: (r, 0)),
        ),
        compiler_params=pltpu.CompilerParams(
            dimension_semantics=("parallel",)),
    )(src2d, emb_table.astype(jnp.float32), alpha2, bias2)

    return out[:rows].reshape(B, S, D)


def make_position_encoding(d_model, max_seq_len=80):
    # Matches the PyTorch double loop (kept for interface parity; the pe result
    # is dead in the reference forward).  Guards the i+1 write for odd d_model.
    pe = np.zeros((max_seq_len, d_model), dtype=np.float32)
    for pos in range(max_seq_len):
        for i in range(0, d_model, 2):
            pe[pos, i] = math.sin(pos / 10000 ** (2 * i / d_model))
            if i + 1 < d_model:
                pe[pos, i + 1] = math.cos(pos / 10000 ** (2 * i / d_model))
    return jnp.asarray(pe)[None, :, :]            # [1, max_seq, D]


if __name__ == "__main__":
    # Small shapes consistent with the module
    vocab_size = 50
    d_model = 32
    N_layers = 2          # stub layers -> identity
    B, S = 2, 8

    key = jax.random.PRNGKey(0)
    k_emb, k_src = jax.random.split(key)

    # Deterministic synthetic parameters
    emb_table = jax.random.normal(k_emb, (vocab_size, d_model), dtype=jnp.float32)
    pe_table = make_position_encoding(d_model, max_seq_len=80)
    alpha = jnp.ones((d_model,), dtype=jnp.float32)   # NormLayer init: ones
    bias = jnp.ones((d_model,), dtype=jnp.float32)    # NormLayer init: ones

    src = jax.random.randint(k_src, (B, S), 0, vocab_size, dtype=jnp.int32)
    mask = jnp.ones((B, 1, S), dtype=jnp.float32)

    out = encoder_forward(src, mask, emb_table, pe_table, alpha, bias)
    out = jax.block_until_ready(out)

    # Reference check in plain JAX (same math: unbiased std, eps added to std)
    x = jnp.take(emb_table, src, axis=0)
    mean = x.mean(axis=-1, keepdims=True)
    std = jnp.sqrt(jnp.sum((x - mean) ** 2, axis=-1, keepdims=True) / (d_model - 1))
    ref = alpha * (x - mean) / (std + 1e-6) + bias
    assert out.shape == (B, S, d_model)
    assert jnp.allclose(out, ref, atol=1e-5, rtol=1e-5), "mismatch vs reference"

    print("KERNEL_OK")
</pallas_src>

<mosaic_0001>
module attributes {stable_mosaic.version = 11 : i64} {
  func.func @_encoder_kernel(%arg0: i32, %arg1: memref<16x1xi32, #tpu.memory_space<vmem>>, %arg2: memref<50x32xf32, #tpu.memory_space<vmem>>, %arg3: memref<1x32xf32, #tpu.memory_space<vmem>>, %arg4: memref<1x32xf32, #tpu.memory_space<vmem>>, %arg5: memref<16x32xf32, #tpu.memory_space<vmem>>) attributes {dimension_semantics = [#tpu.dimension_semantics<parallel>], iteration_bounds = array<i64: 1>, scalar_prefetch = 0 : i64, scratch_operands = 0 : i64, tpu.core_type = #tpu.core_type<tc>, window_params = [{transform_indices = @transform_0, window_bounds = array<i64: 16, 1>}, {pipeline_mode = #tpu.pipeline_mode<synchronous>, transform_indices = @transform_1, window_bounds = array<i64: 50, 32>}, {pipeline_mode = #tpu.pipeline_mode<synchronous>, transform_indices = @transform_2, window_bounds = array<i64: 1, 32>}, {pipeline_mode = #tpu.pipeline_mode<synchronous>, transform_indices = @transform_3, window_bounds = array<i64: 1, 32>}, {transform_indices = @transform_4, window_bounds = array<i64: 16, 32>}]} {
    %c0 = arith.constant 0 : index
    %c0_0 = arith.constant 0 : index
    %0 = vector.load %arg1[%c0, %c0_0] : memref<16x1xi32, #tpu.memory_space<vmem>>, vector<16x1xi32>
    %1 = tpu.iota {dimensions = array<i32: 1>} : vector<16x50xi32>
    %2 = vector.broadcast %0 : vector<16x1xi32> to vector<16x50xi32>
    %3 = arith.cmpi eq, %1, %2 : vector<16x50xi32>
    %4 = arith.extui %3 : vector<16x50xi1> to vector<16x50xi32>
    %5 = arith.sitofp %4 : vector<16x50xi32> to vector<16x50xf32>
    %c0_1 = arith.constant 0 : index
    %c0_2 = arith.constant 0 : index
    %6 = vector.load %arg2[%c0_1, %c0_2] : memref<50x32xf32, #tpu.memory_space<vmem>>, vector<50x32xf32>
    %cst = arith.constant dense<0.000000e+00> : vector<16x32xf32>
    %7 = tpu.matmul %5, %6, %cst {dimension_numbers = #tpu.dot_dimension_numbers<[1], [0], [0], [1], [0, 0, 1, 1], [], []>} : vector<16x50xf32>, vector<50x32xf32>, vector<16x32xf32> -> vector<16x32xf32>
    %cst_3 = arith.constant dense<0.000000e+00> : vector<16xf32>
    %8 = vector.multi_reduction <add>, %7, %cst_3 [1] : vector<16x32xf32> to vector<16xf32>
    %9 = vector.shape_cast %8 : vector<16xf32> to vector<16x1xf32>
    %cst_4 = arith.constant 3.200000e+01 : f32
    %10 = vector.broadcast %cst_4 : f32 to vector<16x1xf32>
    %11 = arith.divf %9, %10 : vector<16x1xf32>
    %12 = vector.broadcast %11 : vector<16x1xf32> to vector<16x32xf32>
    %13 = arith.subf %7, %12 : vector<16x32xf32>
    %14 = arith.mulf %13, %13 : vector<16x32xf32>
    %cst_5 = arith.constant dense<0.000000e+00> : vector<16xf32>
    %15 = vector.multi_reduction <add>, %14, %cst_5 [1] : vector<16x32xf32> to vector<16xf32>
    %16 = vector.shape_cast %15 : vector<16xf32> to vector<16x1xf32>
    %cst_6 = arith.constant 3.100000e+01 : f32
    %17 = vector.broadcast %cst_6 : f32 to vector<16x1xf32>
    %18 = arith.divf %16, %17 : vector<16x1xf32>
    %19 = math.sqrt %18 : vector<16x1xf32>
    %cst_7 = arith.constant 9.99999997E-7 : f32
    %20 = vector.broadcast %cst_7 : f32 to vector<16x1xf32>
    %21 = arith.addf %19, %20 : vector<16x1xf32>
    %22 = tpu.reciprocal %21 : vector<16x1xf32> -> vector<16x1xf32>
    %c0_8 = arith.constant 0 : index
    %c0_9 = arith.constant 0 : index
    %23 = vector.load %arg3[%c0_8, %c0_9] : memref<1x32xf32, #tpu.memory_space<vmem>>, vector<1x32xf32>
    %24 = vector.broadcast %23 : vector<1x32xf32> to vector<16x32xf32>
    %25 = arith.mulf %24, %13 : vector<16x32xf32>
    %26 = vector.broadcast %22 : vector<16x1xf32> to vector<16x32xf32>
    %27 = arith.mulf %25, %26 : vector<16x32xf32>
    %c0_10 = arith.constant 0 : index
    %c0_11 = arith.constant 0 : index
    %28 = vector.load %arg4[%c0_10, %c0_11] : memref<1x32xf32, #tpu.memory_space<vmem>>, vector<1x32xf32>
    %29 = vector.broadcast %28 : vector<1x32xf32> to vector<16x32xf32>
    %30 = arith.addf %27, %29 : vector<16x32xf32>
    %c0_12 = arith.constant 0 : index
    %c0_13 = arith.constant 0 : index
    %31 = vector.load %arg5[%c0_12, %c0_13] : memref<16x32xf32, #tpu.memory_space<vmem>>, vector<16x32xf32>
    tpu.vector_store %arg5[%c0_12, %c0_13], %30 {strides = array<i32>} : memref<16x32xf32, #tpu.memory_space<vmem>>, vector<16x32xf32>,
    return
  }
  func.func @transform_0(%arg0: i32) -> (i32, i32) {
    %c0_i32 = arith.constant 0 : i32
    %c0_i32_0 = arith.constant 0 : i32
    return %arg0, %c0_i32 : i32, i32
  }
  func.func @transform_1(%arg0: i32) -> (i32, i32) {
    %c0_i32 = arith.constant 0 : i32
    %c0_i32_0 = arith.constant 0 : i32
    %c0_i32_1 = arith.constant 0 : i32
    return %c0_i32, %c0_i32_0 : i32, i32
  }
  func.func @transform_2(%arg0: i32) -> (i32, i32) {
    %c0_i32 = arith.constant 0 : i32
    %c0_i32_0 = arith.constant 0 : i32
    %c0_i32_1 = arith.constant 0 : i32
    return %c0_i32, %c0_i32_0 : i32, i32
  }
  func.func @transform_3(%arg0: i32) -> (i32, i32) {
    %c0_i32 = arith.constant 0 : i32
    %c0_i32_0 = arith.constant 0 : i32
    %c0_i32_1 = arith.constant 0 : i32
    return %c0_i32, %c0_i32_0 : i32, i32
  }
  func.func @transform_4(%arg0: i32) -> (i32, i32) {
    %c0_i32 = arith.constant 0 : i32
    %c0_i32_0 = arith.constant 0 : i32
    return %arg0, %c0_i32 : i32, i32
  }
}

</mosaic_0001>

<bundles_post_ra>
// kernel: tpu_custom_call.1
= control target key start
LH: loop header
LB: loop body
LE: loop exit
PB: predicated region body
PF: predicated region fallthrough
CT: control target
= control target key end

     0   :  { %v289_v2 = vmov 0   ;;  %s370_s0 = inlined_call_operand.vmem [shape: s32[16,1], index: 0, kind: input, shape index: {}]   ;;  %s371_s1 = inlined_call_operand.vmem [shape: f32[50,32], index: 1, kind: input, shape index: {}]   ;;  %s372_s2 = inlined_call_operand.vmem [shape: f32[1,32], index: 2, kind: input, shape index: {}]   ;;  %s373_s3 = inlined_call_operand.vmem [shape: f32[1,32], index: 3, kind: input, shape index: {}]   ;;  %s374_s4 = inlined_call_operand.hbm [shape: f32[16,32], index: 4, kind: output, shape index: {}]  }
   0x1   :  { %v18_v0 = vld [vmem:[%s370_s0] sm:$0xff]  ;;  %256 = vset.pattern.permute.xlu0 %v289_v2  ;;  %v35_v3 = vld [vmem:[%s371_s1 + $0x8] sm:$0xff]  ;;  %v36_v4 = vld [vmem:[%s371_s1 + $0x10] sm:$0xff] }
   0x2   :  { %v34_v1 = vld [vmem:[%s371_s1] sm:$0xff]  ;;  %v37_v5 = vld [vmem:[%s371_s1 + $0x18] sm:$0xff]  ;;  %23 = vperm.xlu0 %256, %v18_v0  }
   0x3   :  { %v239_v6 = vpack.c.bf16 %v35_v3, %v34_v1  ;;  %v243_v7 = vpack.c.bf16 %v37_v5, %v36_v4 }
   0x4   :  { %9 = vsyncpa [#allocation3], 0  ;;  %v19_v8 = vld [vmem:[%s370_s0 + $0x8] sm:$0xff]  ;;  %v38_v9 = vld [vmem:[%s371_s1 + $0x20] sm:$0xff]  ;;  %vm48_vm0 = vcmask 1041408   ;;  %v20_v13 = vlaneseq  ;;  %vm41_vm1 = vcmask 408576  }
   0x5   :  { %v39_v10 = vld [vmem:[%s371_s1 + $0x28] sm:$0xff]  ;;  %240 = vmatprep.subr.bf16.mxu0 %v239_v6  ;;  %v40_v12 = vld [vmem:[%s371_s1 + $0x30] sm:$0x3]  ;;  %v290_v16 = vmov 0.0   ;;  %vm127_vm4 = vcmask 261120   ;;  %s291_s9 = smov [#allocation2]  }
   0x6   :  { %242 = vmatpush3.bf16.msra.mxu0 %v239_v6  ;;  %26 = vperm.xlu0 %256, %v19_v8   ;;  %v247_v11 = vpack.c.bf16 %v39_v10, %v38_v9  ;;  %v21_v14 = vand.u32 127, %v20_v13  ;;  %v211_v50 = vld [vmem:[%s372_s2] ss:$0 sm:$0xff]  ;;  %s195_s10 = sshll.u32 %s291_s9, 4  ;;  %s196_s10 = int_to_ptr.vmem [resolvable:$true] %s195_s10 }
   0x7   :  { %244 = vmatprep.subr.bf16.mxu0 %v243_v7  ;;  %v212_v53 = vld [vmem:[%s373_s3] ss:$0 sm:$0xff]  ;;  %s265_s2 = scalar_lea.vmem %s196_s10, 256  ;;  %p270_p1 = scmp.lt.s32.totalorder %s196_s10, %s196_s10 }
   0x8   :  { %p266_p0 = scmp.ne.s32.totalorder %s196_s10, %s265_s2  ;;  %p271_p2 = scmp.lt.s32.totalorder %s265_s2, %s265_s2 }
   0xa   :  { %246 = vmatpush3.bf16.msra.mxu0 %v243_v7  ;;  %p272_p3 = por %p271_p2, %p270_p1 }
   0xb   :  { %248 = vmatprep.subr.bf16.mxu0 %v247_v11 }
   0xc   :  { %p273_p4 = pnand %p272_p3, %p266_p0 }
   0xe   :  { %250 = vmatpush3.bf16.msra.mxu0 %v247_v11 }
   0xf   :  { %234 = vmatprep.subr.msk.mxu0 %vm48_vm0, %v40_v12 }
  0x12   :  { %235 = vmatpush3.msk.msra.mxu0 %vm48_vm0, %v40_v12 }
  0x81   :  { %v24_v15 = vpop.permute.xlu0 %23 }
  0x82   :  { %vm28_vm2 = vcmp.eq.s32.totalorder %v21_v14, %v24_v15 }
  0x83   :  { %v206_v17 = vsel %vm28_vm2, 1.0, %v290_v16 }
  0x84   :  { %236 = vmatprep.mubr.msk.f32.mxu0 %vm41_vm1, %v206_v17 }
  0x85   :  { %v27_v18 = vpop.permute.xlu0 %26 }
  0x86   :  { %vm29_vm3 = vcmp.eq.s32.totalorder %v21_v14, %v27_v18 }
  0x87   :  { %v207_v19 = vsel %vm29_vm3, 1.0, %v290_v16 }
  0x88   :  { %237 = vmatmul.mubr.msk.f32.vlgmr.msra.gmra.mrb[0].mxu0 %vm41_vm1, %v207_v19 }
 0x15b   :  { %v238_v20 = vpop.f32.mrb[0].mxu0 }
 0x15c   :  { %v118_v21 = vpop.f32.mrb[1].mxu0  ;;  %v131_v23 = vsel %vm127_vm4, %v238_v20, 0.0 }
 0x15d   :  { %v128_v22 = vsel %vm127_vm4, %v118_v21, 0.0 }
 0x15e   :  { %129 = vadd.xlane.f32.xlu1 %v128_v22 }
 0x162   :  { %132 = vadd.xlane.f32.xlu1 %v131_v23 }
 0x1eb   :  { %v130_v24 = vpop.xlane.xlu1 %129 }
 0x1ec   :  { %v135_v25 = vmul.f32 0.03125, %v130_v24 }
 0x1ee   :  { %v137_v26 = vsub.f32 %v118_v21, %v135_v25 }
 0x1ef   :  { %v133_v27 = vpop.xlane.xlu1 %132 }
 0x1f0   :  { %v136_v28 = vmul.f32 0.03125, %v133_v27  ;;  %v139_v29 = vmul.f32 %v137_v26, %v137_v26  ;;  %v175_v51 = vmul.f32 %v211_v50, %v137_v26 }
 0x1f2   :  { %v138_v30 = vsub.f32 %v238_v20, %v136_v28  ;;  %v141_v31 = vsel %vm127_vm4, %v139_v29, 0.0 }
 0x1f3   :  { %142 = vadd.xlane.f32.xlu0 %v141_v31 }
 0x1f4   :  { %v140_v32 = vmul.f32 %v138_v30, %v138_v30  ;;  %v176_v55 = vmul.f32 %v211_v50, %v138_v30 }
 0x1f6   :  { %v144_v33 = vsel %vm127_vm4, %v140_v32, 0.0 }
 0x1f7   :  { %145 = vadd.xlane.f32.xlu1 %v144_v33 }
 0x280   :  { %v143_v34 = vpop.xlane.xlu0 %142 }
 0x281   :  { %v148_v35 = vmul.f32 0.032258064, %v143_v34 }
 0x283   :  { %257 = vrsqrt.f32 %v148_v35  ;;  %vm152_vm5 = vcmp.eq.f32.partialorder %v148_v35, inf  ;;  %v155_v40 = vand.u32 2147483648, %v148_v35  ;;  %vm154_vm6 = vcmp.eq.f32.partialorder %v148_v35, 0.0 }
 0x284   :  { %v146_v36 = vpop.xlane.xlu1 %145 }
 0x285   :  { %v149_v37 = vmul.f32 0.032258064, %v146_v36 }
 0x287   :  { %259 = vrsqrt.f32 %v149_v37  ;;  %vm159_vm7 = vcmp.eq.f32.partialorder %v149_v37, inf  ;;  %v162_v46 = vand.u32 2147483648, %v149_v37  ;;  %vm161_vm8 = vcmp.eq.f32.partialorder %v149_v37, 0.0 }
 0x28d   :  { %v258_v38 = vpop.eup %257 }
 0x28e   :  { %v151_v39 = vmul.f32 %v258_v38, %v148_v35 }
 0x290   :  { %v153_v41 = vsel %vm152_vm5, %v148_v35, %v151_v39 }
 0x291   :  { %v260_v42 = vpop.eup %259  ;;  %v156_v43 = vsel %vm154_vm6, %v155_v40, %v153_v41 }
 0x292   :  { %v164_v44 = vadd.f32 1e-06, %v156_v43  ;;  %v158_v45 = vmul.f32 %v260_v42, %v149_v37 }
 0x294   :  { %261 = vrcp.f32 %v164_v44  ;;  %v160_v47 = vsel %vm159_vm7, %v149_v37, %v158_v45 }
 0x295   :  { %v163_v48 = vsel %vm161_vm8, %v162_v46, %v160_v47 }
 0x296   :  { %v165_v49 = vadd.f32 1e-06, %v163_v48 }
 0x298   :  { %263 = vrcp.f32 %v165_v49 }
 0x29e   :  { %v262_v52 = vpop.eup %261 }
 0x29f   :  { %v177_v54 = vmul.f32 %v262_v52, %v175_v51 }
 0x2a1   :  { %v186_v56 = vadd.f32 %v212_v53, %v177_v54 }
 0x2a2   :  { %v264_v57 = vpop.eup %263 }
 0x2a3   :  { %v178_v58 = vmul.f32 %v264_v57, %v176_v55  ;;  %188 = vst.msk [vmem:[#allocation2] sm:$0xff] %vm127_vm4, %v186_v56 }
 0x2a5   :  { %v187_v59 = vadd.f32 %v212_v53, %v178_v58 }
 0x2a7   :  { %189 = vst.msk [vmem:[#allocation2 + $0x8] sm:$0xff] %vm127_vm4, %v187_v59 }
 0x2a8   :  { %276 = shalt.err (!%p273_p4)
}
 0x2a9   :  { %s277_s12 = scalar_lea.hbm %s374_s4, 256 }
 0x2aa   :  { %p278_p5 = scmp.ne.s32.totalorder %s374_s4, %s277_s12  ;;  %p281_p6 = scmp.lt.u32.totalorder %s277_s12, %s374_s4 }
 0x2ac   :  { %p283_p7 = pnand %p281_p6, %p278_p5 }
 0x2ae   :  { %286 = shalt.err (!%p283_p7)
}
 0x2af   :  { %s292_s17 = smov 128   ;;  %s293_s18 = smov 8  }
 0x2b0   :  { %201 = dma.vmem_to_hbm [thread:$0]  %s196_s10, 256, %s374_s4, [#allocation3], %s292_s17, %s292_s17, %s293_s18  }
 0x2b1   :  { %287 = dma.done.wait [#allocation3], 256  }
 0x2b2   :  { %288 = vsyncadd [#allocation3], 4294967040 }
 0x2b3   :  { %205 = vsyncpa [#allocation3], 1 }

</bundles_post_ra>
